<compile_context>
chip_gen: v7x
topology: tpu7x:2x2x1
jax: 0.10.0
libtpu: 0.0.40
codegen_flags: <defaults>
</compile_context>

<pallas_src>
import functools

import jax
import jax.numpy as jnp
from jax.experimental import pallas as pl
from jax.experimental.pallas import tpu as pltpu

_LANE = 128      # pad every feature dim to a multiple of the lane width
_SUBLANE = 8     # pad the batch to a multiple of the sublane width


def _round_up(x, m):
    return ((x + m - 1) // m) * m


def _make_fused_encoder_kernel(n_layers, use_bf16):
    """Fused kernel: o = relu(...relu(relu(x@w0+b0)@w1+b1)...) for one batch tile.

    Kernel argument order: (x_ref, w0, b0, ..., w_{n-1}, b_{n-1}, o_ref).
    Weights/biases are resident blocks; the intermediate activation stays in
    VMEM/vregs for the whole layer stack (no HBM round-trips).
    """
    compute_dt = jnp.bfloat16 if use_bf16 else jnp.float32

    def kernel(x_ref, *refs):
        o_ref = refs[-1]
        h = x_ref[...].astype(compute_dt)
        for li in range(n_layers):            # static unroll over the known layer list
            w = refs[2 * li][...].astype(compute_dt)
            b = refs[2 * li + 1][...].astype(jnp.float32)   # (1, Dout) broadcasts over rows
            y = jnp.dot(h, w, preferred_element_type=jnp.float32)
            y = jnp.maximum(y + b, 0.0)                      # act_fn = ReLU, f32 epilogue
            h = y.astype(compute_dt) if li + 1 < n_layers else y
        o_ref[...] = h.astype(o_ref.dtype)

    return kernel


def encoder_forward(x, params, sparse=False, *, tm=256, use_bf16=False,
                    vmem_budget_bytes=48 << 20):
    """Equivalent of Encoder.forward(X, sparse): one fused Linear+ReLU stack kernel."""
    del sparse  # unused by the reference module
    B, D = x.shape
    n_layers = len(params)
    dims = [D] + [w.shape[1] for (w, _) in params]
    dims_pad = [_round_up(d, _LANE) for d in dims]

    # Batch tiling: big lane-dense tiles; pad any batch to the tile (no hard assert).
    b_tile = min(tm, _round_up(B, _SUBLANE))
    b_pad = _round_up(B, b_tile)

    # Zero-pad X and every (W, b) so feature dims are multiples of 128. Padded
    # activation columns remain exactly zero through the stack (zero weight
    # rows/cols, zero bias, ReLU(0)=0), so results are unchanged.
    x_p = jnp.zeros((b_pad, dims_pad[0]), x.dtype).at[:B, :D].set(x)
    flat_params = []
    for li, (w, b) in enumerate(params):
        din, dout = dims[li], dims[li + 1]
        dinp, doutp = dims_pad[li], dims_pad[li + 1]
        wp = jnp.zeros((dinp, doutp), w.dtype).at[:din, :dout].set(w)
        bp = jnp.zeros((1, doutp), b.dtype).at[:, :dout].set(b.reshape(1, dout))
        flat_params += [wp, bp]

    # Conservative VMEM budget (double-buffer everything); keeps us honest on
    # v7x's 64 MiB VMEM.
    itemsize = 4
    weight_bytes = sum(dims_pad[i] * dims_pad[i + 1] + dims_pad[i + 1]
                       for i in range(n_layers)) * itemsize
    act_bytes = b_tile * max(dims_pad) * itemsize
    est_bytes = (2 * b_tile * dims_pad[0] * itemsize + 2 * weight_bytes
                 + 2 * b_tile * dims_pad[-1] * itemsize + 2 * act_bytes)
    if est_bytes > vmem_budget_bytes:
        # TODO(synk): add an N (Dout) grid axis + K tiling for production widths
        # instead of keeping full per-layer weights resident.
        raise ValueError(
            f"fused encoder tiles need ~{est_bytes / 2**20:.1f} MiB VMEM "
            f"(> budget {vmem_budget_bytes / 2**20:.1f} MiB); reduce tm or tile Dout")

    grid = (b_pad // b_tile,)
    in_specs = [pl.BlockSpec((b_tile, dims_pad[0]), lambda i: (i, 0))]   # batch-tiled X
    for li in range(n_layers):
        dinp, doutp = dims_pad[li], dims_pad[li + 1]
        in_specs.append(pl.BlockSpec((dinp, doutp), lambda i: (0, 0)))   # resident W_li
        in_specs.append(pl.BlockSpec((1, doutp), lambda i: (0, 0)))      # resident b_li
    out_specs = pl.BlockSpec((b_tile, dims_pad[-1]), lambda i: (i, 0))   # lane-dense out

    flops = 2 * b_pad * sum(dims_pad[i] * dims_pad[i + 1] for i in range(n_layers))
    bytes_accessed = ((x_p.size + sum(p.size for p in flat_params)) * itemsize
                      + b_pad * dims_pad[-1] * itemsize)

    out = pl.pallas_call(
        _make_fused_encoder_kernel(n_layers, use_bf16),
        out_shape=jax.ShapeDtypeStruct((b_pad, dims_pad[-1]), x.dtype),
        grid_spec=pltpu.PrefetchScalarGridSpec(
            num_scalar_prefetch=0,
            grid=grid,
            in_specs=in_specs,
            out_specs=out_specs,
        ),
        compiler_params=pltpu.CompilerParams(
            dimension_semantics=("parallel",),
            vmem_limit_bytes=int(min(64 << 20, max(est_bytes * 2, 16 << 20))),
        ),
        cost_estimate=pl.CostEstimate(
            flops=flops, transcendentals=0, bytes_accessed=bytes_accessed),
    )(x_p, *flat_params)

    return out[:B, :dims[-1]]


def init_encoder_params(key, D, layers, dtype=jnp.float32):
    """Deterministic init mirroring nn.Linear default (uniform +/- 1/sqrt(fan_in))."""
    params = []
    dims = [D] + list(layers)
    for i in range(len(layers)):
        fan_in, fan_out = dims[i], dims[i + 1]
        key, kw, kb = jax.random.split(key, 3)
        bound = 1.0 / jnp.sqrt(fan_in)
        w = jax.random.uniform(kw, (fan_in, fan_out), dtype, -bound, bound)
        b = jax.random.uniform(kb, (1, fan_out), dtype, -bound, bound)
        params.append((w, b))
    return params


if __name__ == "__main__":
    # Module-consistent shapes: X is [B, D]; hidden layers [64, 32, 16].
    # B=512 keeps the problem tiny but gives 2 parallel batch-grid steps (tm=256).
    B, D = 512, 32
    layers = [64, 32, 16]

    key = jax.random.PRNGKey(0)
    key, kx = jax.random.split(key)
    x = jax.random.normal(kx, (B, D), dtype=jnp.float32)
    params = init_encoder_params(key, D, layers)

    fwd = jax.jit(functools.partial(encoder_forward, sparse=False))
    out = jax.block_until_ready(fwd(x, params))

    # Pure-JAX reference check (same math, no Pallas).
    ref = x
    for w, b in params:
        ref = jnp.maximum(ref @ w + b, 0.0)
    assert out.shape == (B, layers[-1])
    assert jnp.allclose(out, ref, atol=1e-5, rtol=1e-5), float(jnp.abs(out - ref).max())

    print("KERNEL_OK")
</pallas_src>

<mosaic_0001>
module attributes {stable_mosaic.version = 11 : i64} {
  func.func @kernel(%arg0: i32, %arg1: memref<256x128xf32, #tpu.memory_space<vmem>>, %arg2: memref<128x128xf32, #tpu.memory_space<vmem>>, %arg3: memref<1x128xf32, #tpu.memory_space<vmem>>, %arg4: memref<128x128xf32, #tpu.memory_space<vmem>>, %arg5: memref<1x128xf32, #tpu.memory_space<vmem>>, %arg6: memref<128x128xf32, #tpu.memory_space<vmem>>, %arg7: memref<1x128xf32, #tpu.memory_space<vmem>>, %arg8: memref<256x128xf32, #tpu.memory_space<vmem>>) attributes {dimension_semantics = [#tpu.dimension_semantics<parallel>], iteration_bounds = array<i64: 2>, scalar_prefetch = 0 : i64, scratch_operands = 0 : i64, tpu.core_type = #tpu.core_type<tc>, window_params = [{transform_indices = @transform_0, window_bounds = array<i64: 256, 128>}, {pipeline_mode = #tpu.pipeline_mode<synchronous>, transform_indices = @transform_1, window_bounds = array<i64: 128, 128>}, {pipeline_mode = #tpu.pipeline_mode<synchronous>, transform_indices = @transform_2, window_bounds = array<i64: 1, 128>}, {pipeline_mode = #tpu.pipeline_mode<synchronous>, transform_indices = @transform_3, window_bounds = array<i64: 128, 128>}, {pipeline_mode = #tpu.pipeline_mode<synchronous>, transform_indices = @transform_4, window_bounds = array<i64: 1, 128>}, {pipeline_mode = #tpu.pipeline_mode<synchronous>, transform_indices = @transform_5, window_bounds = array<i64: 128, 128>}, {pipeline_mode = #tpu.pipeline_mode<synchronous>, transform_indices = @transform_6, window_bounds = array<i64: 1, 128>}, {transform_indices = @transform_7, window_bounds = array<i64: 256, 128>}]} {
    %c0 = arith.constant 0 : index
    %c0_0 = arith.constant 0 : index
    %0 = vector.load %arg1[%c0, %c0_0] : memref<256x128xf32, #tpu.memory_space<vmem>>, vector<256x128xf32>
    %c0_1 = arith.constant 0 : index
    %c0_2 = arith.constant 0 : index
    %1 = vector.load %arg2[%c0_1, %c0_2] : memref<128x128xf32, #tpu.memory_space<vmem>>, vector<128x128xf32>
    %c0_3 = arith.constant 0 : index
    %c0_4 = arith.constant 0 : index
    %2 = vector.load %arg3[%c0_3, %c0_4] : memref<1x128xf32, #tpu.memory_space<vmem>>, vector<1x128xf32>
    %cst = arith.constant dense<0.000000e+00> : vector<256x128xf32>
    %3 = tpu.matmul %0, %1, %cst {dimension_numbers = #tpu.dot_dimension_numbers<[1], [0], [0], [1], [0, 0, 1, 1], [], []>} : vector<256x128xf32>, vector<128x128xf32>, vector<256x128xf32> -> vector<256x128xf32>
    %4 = vector.broadcast %2 : vector<1x128xf32> to vector<256x128xf32>
    %5 = arith.addf %3, %4 : vector<256x128xf32>
    %cst_5 = arith.constant 0.000000e+00 : f32
    %6 = vector.broadcast %cst_5 : f32 to vector<256x128xf32>
    %7 = arith.maximumf %5, %6 : vector<256x128xf32>
    %c0_6 = arith.constant 0 : index
    %c0_7 = arith.constant 0 : index
    %8 = vector.load %arg4[%c0_6, %c0_7] : memref<128x128xf32, #tpu.memory_space<vmem>>, vector<128x128xf32>
    %c0_8 = arith.constant 0 : index
    %c0_9 = arith.constant 0 : index
    %9 = vector.load %arg5[%c0_8, %c0_9] : memref<1x128xf32, #tpu.memory_space<vmem>>, vector<1x128xf32>
    %cst_10 = arith.constant dense<0.000000e+00> : vector<256x128xf32>
    %10 = tpu.matmul %7, %8, %cst_10 {dimension_numbers = #tpu.dot_dimension_numbers<[1], [0], [0], [1], [0, 0, 1, 1], [], []>} : vector<256x128xf32>, vector<128x128xf32>, vector<256x128xf32> -> vector<256x128xf32>
    %11 = vector.broadcast %9 : vector<1x128xf32> to vector<256x128xf32>
    %12 = arith.addf %10, %11 : vector<256x128xf32>
    %cst_11 = arith.constant 0.000000e+00 : f32
    %13 = vector.broadcast %cst_11 : f32 to vector<256x128xf32>
    %14 = arith.maximumf %12, %13 : vector<256x128xf32>
    %c0_12 = arith.constant 0 : index
    %c0_13 = arith.constant 0 : index
    %15 = vector.load %arg6[%c0_12, %c0_13] : memref<128x128xf32, #tpu.memory_space<vmem>>, vector<128x128xf32>
    %c0_14 = arith.constant 0 : index
    %c0_15 = arith.constant 0 : index
    %16 = vector.load %arg7[%c0_14, %c0_15] : memref<1x128xf32, #tpu.memory_space<vmem>>, vector<1x128xf32>
    %cst_16 = arith.constant dense<0.000000e+00> : vector<256x128xf32>
    %17 = tpu.matmul %14, %15, %cst_16 {dimension_numbers = #tpu.dot_dimension_numbers<[1], [0], [0], [1], [0, 0, 1, 1], [], []>} : vector<256x128xf32>, vector<128x128xf32>, vector<256x128xf32> -> vector<256x128xf32>
    %18 = vector.broadcast %16 : vector<1x128xf32> to vector<256x128xf32>
    %19 = arith.addf %17, %18 : vector<256x128xf32>
    %cst_17 = arith.constant 0.000000e+00 : f32
    %20 = vector.broadcast %cst_17 : f32 to vector<256x128xf32>
    %21 = arith.maximumf %19, %20 : vector<256x128xf32>
    %c0_18 = arith.constant 0 : index
    %c0_19 = arith.constant 0 : index
    %22 = vector.load %arg8[%c0_18, %c0_19] : memref<256x128xf32, #tpu.memory_space<vmem>>, vector<256x128xf32>
    tpu.vector_store %arg8[%c0_18, %c0_19], %21 {strides = array<i32>} : memref<256x128xf32, #tpu.memory_space<vmem>>, vector<256x128xf32>,
    return
  }
  func.func @transform_0(%arg0: i32) -> (i32, i32) {
    %c0_i32 = arith.constant 0 : i32
    %c0_i32_0 = arith.constant 0 : i32
    return %arg0, %c0_i32 : i32, i32
  }
  func.func @transform_1(%arg0: i32) -> (i32, i32) {
    %c0_i32 = arith.constant 0 : i32
    %c0_i32_0 = arith.constant 0 : i32
    %c0_i32_1 = arith.constant 0 : i32
    return %c0_i32, %c0_i32_0 : i32, i32
  }
  func.func @transform_2(%arg0: i32) -> (i32, i32) {
    %c0_i32 = arith.constant 0 : i32
    %c0_i32_0 = arith.constant 0 : i32
    %c0_i32_1 = arith.constant 0 : i32
    return %c0_i32, %c0_i32_0 : i32, i32
  }
  func.func @transform_3(%arg0: i32) -> (i32, i32) {
    %c0_i32 = arith.constant 0 : i32
    %c0_i32_0 = arith.constant 0 : i32
    %c0_i32_1 = arith.constant 0 : i32
    return %c0_i32, %c0_i32_0 : i32, i32
  }
  func.func @transform_4(%arg0: i32) -> (i32, i32) {
    %c0_i32 = arith.constant 0 : i32
    %c0_i32_0 = arith.constant 0 : i32
    %c0_i32_1 = arith.constant 0 : i32
    return %c0_i32, %c0_i32_0 : i32, i32
  }
  func.func @transform_5(%arg0: i32) -> (i32, i32) {
    %c0_i32 = arith.constant 0 : i32
    %c0_i32_0 = arith.constant 0 : i32
    %c0_i32_1 = arith.constant 0 : i32
    return %c0_i32, %c0_i32_0 : i32, i32
  }
  func.func @transform_6(%arg0: i32) -> (i32, i32) {
    %c0_i32 = arith.constant 0 : i32
    %c0_i32_0 = arith.constant 0 : i32
    %c0_i32_1 = arith.constant 0 : i32
    return %c0_i32, %c0_i32_0 : i32, i32
  }
  func.func @transform_7(%arg0: i32) -> (i32, i32) {
    %c0_i32 = arith.constant 0 : i32
    %c0_i32_0 = arith.constant 0 : i32
    return %arg0, %c0_i32 : i32, i32
  }
}

</mosaic_0001>

<bundles_post_ra>
// kernel: encoder_forward.1
= control target key start
LH: loop header
LB: loop body
LE: loop exit
PB: predicated region body
PF: predicated region fallthrough
CT: control target
= control target key end

     0   :  { %s1808_s24 = smov 0   ;;  %s2176_s0 = inlined_call_operand.vmem [shape: f32[512,128], index: 0, kind: input, shape index: {}]   ;;  %s2177_s1 = inlined_call_operand.vmem [shape: f32[128,128], index: 1, kind: input, shape index: {}]   ;;  %s2178_s2 = inlined_call_operand.vmem [shape: f32[1,128], index: 2, kind: input, shape index: {}]   ;;  %s2179_s3 = inlined_call_operand.vmem [shape: f32[128,128], index: 3, kind: input, shape index: {}]   ;;  %s2180_s4 = inlined_call_operand.vmem [shape: f32[1,128], index: 4, kind: input, shape index: {}]   ;;  %s2181_s5 = inlined_call_operand.vmem [shape: f32[128,128], index: 5, kind: input, shape index: {}]   ;;  %s2182_s6 = inlined_call_operand.vmem [shape: f32[1,128], index: 6, kind: input, shape index: {}]   ;;  %s2183_s7 = inlined_call_operand.vmem [shape: f32[512,128], index: 7, kind: output, shape index: {}]  }
   0x1 LB: > { %s1242_s25 = sadd.s32 4294967295, %s1766_s24   ;;  %p1246_p0 = scmp.ge.s32.totalorder %s1766_s24, 1  ;;  %s1766_s24 = sphi %s1808_s24, %s17_s24  }
   0x2   : > { %p238_p1 = scmp.lt.s32.totalorder %s1766_s24, 3 }
   0x4   : > { %p239_p2 = pnand %p1246_p0, %p238_p1 }
   0x5   : > { %v314_v0 = vld [vmem:[%s2177_s1] sm:$0xff] (!%p239_p2)  ;;  %v315_v1 = vld [vmem:[%s2177_s1 + $0x8] sm:$0xff] (!%p239_p2)  ;;  %v316_v2 = vld [vmem:[%s2177_s1 + $0x10] sm:$0xff] (!%p239_p2)  ;;  %s1247_s9 = sshll.u32 (!%p239_p2), %s1242_s25, 5 }
   0x6   : > { %242 = sbr.rel (%p239_p2) target bundleno = 754 (0x2f2), region = 48  ;;  %v1640_v3 = vpack.c.bf16 (!%p239_p2), %v315_v1, %v314_v0  ;;  %v317_v4 = vld [vmem:[%s2177_s1 + $0x18] sm:$0xff] (!%p239_p2)  ;;  %p271_p3 = scmp.lt.s32.totalorder (!%p239_p2), %s1247_s9, 63  ;;  %v318_v6 = vld [vmem:[%s2177_s1 + $0x20] sm:$0xff] (!%p239_p2)  ;;  %v319_v7 = vld [vmem:[%s2177_s1 + $0x28] sm:$0xff] (!%p239_p2) }
   0x7   : > { %v1644_v5 = vpack.c.bf16 (!%p239_p2), %v317_v4, %v316_v2  ;;  %v1648_v8 = vpack.c.bf16 (!%p239_p2), %v319_v7, %v318_v6  ;;  %v320_v9 = vld [vmem:[%s2177_s1 + $0x30] sm:$0xff] (!%p239_p2)  ;;  %v321_v10 = vld [vmem:[%s2177_s1 + $0x38] sm:$0xff] (!%p239_p2)  ;;  %v322_v13 = vld [vmem:[%s2177_s1 + $0x40] sm:$0xff] (!%p239_p2) }
   0x8   : > { %1641 = vmatprep.subr.bf16.mxu0 (!%p239_p2), %v1640_v3  ;;  %1736 = vmatprep.subr.bf16.mxu1 (!%p239_p2), %v1640_v3  ;;  %v1652_v12 = vpack.c.bf16 (!%p239_p2), %v321_v10, %v320_v9  ;;  %v323_v14 = vld [vmem:[%s2177_s1 + $0x48] sm:$0xff] (!%p239_p2)  ;;  %v324_v17 = vld [vmem:[%s2177_s1 + $0x50] sm:$0xff] (!%p239_p2)  ;;  %v325_v18 = vld [vmem:[%s2177_s1 + $0x58] sm:$0xff] (!%p239_p2) }
   0x9   : > { %1643 = vmatpush3.bf16.msra.mxu0 (!%p239_p2), %v1640_v3  ;;  %1744 = vmatpush3.bf16.msra.mxu1 (!%p239_p2), %v1640_v3  ;;  %v1656_v16 = vpack.c.bf16 (!%p239_p2), %v323_v14, %v322_v13  ;;  %v1660_v19 = vpack.c.bf16 (!%p239_p2), %v325_v18, %v324_v17  ;;  %v326_v20 = vld [vmem:[%s2177_s1 + $0x60] sm:$0xff] (!%p239_p2)  ;;  %v327_v21 = vld [vmem:[%s2177_s1 + $0x68] sm:$0xff] (!%p239_p2)  ;;  %v328_v23 = vld [vmem:[%s2177_s1 + $0x70] sm:$0xff] (!%p239_p2) }
   0xa   : > { %1645 = vmatprep.subr.bf16.mxu0 (!%p239_p2), %v1644_v5  ;;  %1737 = vmatprep.subr.bf16.mxu1 (!%p239_p2), %v1644_v5  ;;  %v1664_v22 = vpack.c.bf16 (!%p239_p2), %v327_v21, %v326_v20  ;;  %v329_v24 = vld [vmem:[%s2177_s1 + $0x78] sm:$0xff] (!%p239_p2)  ;;  %v594_v26 = vld [vmem:[%s2179_s3] sm:$0xff] (!%p239_p2)  ;;  %v595_v27 = vld [vmem:[%s2179_s3 + $0x8] sm:$0xff] (!%p239_p2) }
   0xb   : > { %v1668_v25 = vpack.c.bf16 (!%p239_p2), %v329_v24, %v328_v23  ;;  %v1672_v28 = vpack.c.bf16 (!%p239_p2), %v595_v27, %v594_v26  ;;  %v596_v29 = vld [vmem:[%s2179_s3 + $0x10] sm:$0xff] (!%p239_p2)  ;;  %v597_v30 = vld [vmem:[%s2179_s3 + $0x18] sm:$0xff] (!%p239_p2)  ;;  %v598_v36 = vld [vmem:[%s2179_s3 + $0x20] sm:$0xff] (!%p239_p2) }
   0xc   : > { %v1676_v35 = vpack.c.bf16 (!%p239_p2), %v597_v30, %v596_v29  ;;  %v599_v37 = vld [vmem:[%s2179_s3 + $0x28] sm:$0xff] (!%p239_p2)  ;;  %v600_v43 = vld [vmem:[%s2179_s3 + $0x30] sm:$0xff] (!%p239_p2)  ;;  %v601_v44 = vld [vmem:[%s2179_s3 + $0x38] sm:$0xff] (!%p239_p2) }
   0xd   : > { %s2185_s9 = smov (!%p271_p3, %s1247_s9), 63  ;;  %1647 = vmatpush3.bf16.msra.mxu0 %v1644_v5  ;;  %1745 = vmatpush3.bf16.msra.mxu1 %v1644_v5  ;;  %v1680_v42 = vpack.c.bf16 %v599_v37, %v598_v36  ;;  %v1684_v49 = vpack.c.bf16 %v601_v44, %v600_v43  ;;  %v602_v50 = vld [vmem:[%s2179_s3 + $0x40] sm:$0xff]  ;;  %v603_v51 = vld [vmem:[%s2179_s3 + $0x48] sm:$0xff]  ;;  %v604_v57 = vld [vmem:[%s2179_s3 + $0x50] sm:$0xff] }
   0xe   : > { %s1248_s16 = sshll.u32 %s2185_s9, 3  ;;  %1649 = vmatprep.subr.bf16.mxu0 %v1648_v8  ;;  %1738 = vmatprep.subr.bf16.mxu1 %v1648_v8  ;;  %v1688_v56 = vpack.c.bf16 %v603_v51, %v602_v50  ;;  %v605_v58 = vld [vmem:[%s2179_s3 + $0x58] sm:$0xff]  ;;  %v606_v0 = vld [vmem:[%s2179_s3 + $0x60] sm:$0xff]  ;;  %v607_v1 = vld [vmem:[%s2179_s3 + $0x68] sm:$0xff] }
   0xf   : > { %s1848_s23 = scalar_lea.vmem %s2176_s0, %s1248_s16  ;;  %v1692_v63 = vpack.c.bf16 %v605_v58, %v604_v57  ;;  %v1696_v6 = vpack.c.bf16 %v607_v1, %v606_v0  ;;  %v608_v13 = vld [vmem:[%s2179_s3 + $0x70] sm:$0xff]  ;;  %v609_v14 = vld [vmem:[%s2179_s3 + $0x78] sm:$0xff]  ;;  %v875_v17 = vld [vmem:[%s2181_s5 + $0x8] sm:$0xff]  ;;  %s2108_s13 = scalar_lea.vmem %s2183_s7, %s1248_s16 }
  0x10   : > { %v282_v11 = vld [vmem:[%s1848_s23] sm:$0xff]  ;;  %v283_v31 = vld [vmem:[%s1848_s23 + $0x8] sm:$0xff]  ;;  %v284_v32 = vld [vmem:[%s1848_s23 + $0x10] sm:$0xff] }
  0x11   : > { %1432 = vmatprep.mubr.f32.mxu0 %v282_v11  ;;  %1651 = vmatpush3.bf16.msra.mxu0 %v1648_v8  ;;  %v298_v15 = vld [vmem:[%s1848_s23 + $0x80] sm:$0xff]  ;;  %v299_v33 = vld [vmem:[%s1848_s23 + $0x88] sm:$0xff]  ;;  %v300_v34 = vld [vmem:[%s1848_s23 + $0x90] sm:$0xff] }
  0x12   : > { %1653 = vmatprep.subr.bf16.mxu0 %v1652_v12  ;;  %1746 = vmatpush3.bf16.msra.mxu1 %v1648_v8  ;;  %v285_v38 = vld [vmem:[%s1848_s23 + $0x18] sm:$0xff]  ;;  %v286_v39 = vld [vmem:[%s1848_s23 + $0x20] sm:$0xff]  ;;  %v287_v45 = vld [vmem:[%s1848_s23 + $0x28] sm:$0xff] }
  0x13   : > { %1739 = vmatprep.subr.bf16.mxu1 %v1652_v12  ;;  %1456 = vmatprep.mubr.f32.mxu1 %v298_v15  ;;  %v301_v40 = vld [vmem:[%s1848_s23 + $0x98] sm:$0xff]  ;;  %v302_v41 = vld [vmem:[%s1848_s23 + $0xa0] sm:$0xff]  ;;  %v288_v46 = vld [vmem:[%s1848_s23 + $0x30] sm:$0xff]  ;;  %v1700_v15 = vpack.c.bf16 %v609_v14, %v608_v13 }
  0x14   : > { %v303_v47 = vld [vmem:[%s1848_s23 + $0xa8] sm:$0xff]  ;;  %v304_v48 = vld [vmem:[%s1848_s23 + $0xb0] sm:$0xff]  ;;  %v289_v52 = vld [vmem:[%s1848_s23 + $0x38] sm:$0xff] }
  0x15   : > { %1655 = vmatpush3.bf16.msra.mxu0 %v1652_v12  ;;  %v290_v53 = vld [vmem:[%s1848_s23 + $0x40] sm:$0xff]  ;;  %v305_v54 = vld [vmem:[%s1848_s23 + $0xb8] sm:$0xff]  ;;  %v291_v59 = vld [vmem:[%s1848_s23 + $0x48] sm:$0xff] }
  0x16   : > { %1657 = vmatprep.subr.bf16.mxu0 %v1656_v16  ;;  %1747 = vmatpush3.bf16.msra.mxu1 %v1652_v12  ;;  %v306_v55 = vld [vmem:[%s1848_s23 + $0xc0] sm:$0xff]  ;;  %v292_v60 = vld [vmem:[%s1848_s23 + $0x50] sm:$0xff]  ;;  %v307_v61 = vld [vmem:[%s1848_s23 + $0xc8] sm:$0xff] }
  0x17   : > { %1740 = vmatprep.subr.bf16.mxu1 %v1656_v16  ;;  %v308_v62 = vld [vmem:[%s1848_s23 + $0xd0] sm:$0xff]  ;;  %v293_v2 = vld [vmem:[%s1848_s23 + $0x58] sm:$0xff]  ;;  %v294_v3 = vld [vmem:[%s1848_s23 + $0x60] sm:$0xff] }
  0x18   : > { %v309_v4 = vld [vmem:[%s1848_s23 + $0xd8] sm:$0xff]  ;;  %v310_v5 = vld [vmem:[%s1848_s23 + $0xe0] sm:$0xff]  ;;  %v295_v7 = vld [vmem:[%s1848_s23 + $0x68] sm:$0xff] }
  0x19   : > { %1659 = vmatpush3.bf16.msra.mxu0 %v1656_v16  ;;  %v296_v8 = vld [vmem:[%s1848_s23 + $0x70] sm:$0xff]  ;;  %v311_v9 = vld [vmem:[%s1848_s23 + $0xe8] sm:$0xff]  ;;  %v297_v11 = vld [vmem:[%s1848_s23 + $0x78] sm:$0xff] }
  0x1a   : > { %1661 = vmatprep.subr.bf16.mxu0 %v1660_v19  ;;  %1748 = vmatpush3.bf16.msra.mxu1 %v1656_v16  ;;  %v312_v10 = vld [vmem:[%s1848_s23 + $0xf0] sm:$0xff]  ;;  %v313_v12 = vld [vmem:[%s1848_s23 + $0xf8] sm:$0xff]  ;;  %v874_v16 = vld [vmem:[%s2181_s5] sm:$0xff] }
  0x1b   : > { %1741 = vmatprep.subr.bf16.mxu1 %v1660_v19  ;;  %v876_v18 = vld [vmem:[%s2181_s5 + $0x10] sm:$0xff]  ;;  %v877_v20 = vld [vmem:[%s2181_s5 + $0x18] sm:$0xff]  ;;  %v879_v23 = vld [vmem:[%s2181_s5 + $0x28] sm:$0xff] }
  0x1c   : > { %v1708_v21 = vpack.c.bf16 %v877_v20, %v876_v18  ;;  %v881_v26 = vld [vmem:[%s2181_s5 + $0x38] sm:$0xff]  ;;  %v883_v29 = vld [vmem:[%s2181_s5 + $0x48] sm:$0xff]  ;;  %v1999_v37 = vld [vmem:[%s2178_s2] ss:$0 sm:$0xff] }
  0x1d   : > { %1663 = vmatpush3.bf16.msra.mxu0 %v1660_v19 }
  0x1e   : > { %1665 = vmatprep.subr.bf16.mxu0 %v1664_v22  ;;  %1749 = vmatpush3.bf16.msra.mxu1 %v1660_v19  ;;  %v1704_v19 = vpack.c.bf16 %v875_v17, %v874_v16 }
  0x1f   : > { %1742 = vmatprep.subr.bf16.mxu1 %v1664_v22 }
  0x21   : > { %1667 = vmatpush3.bf16.msra.mxu0 %v1664_v22 }
  0x22   : > { %1669 = vmatprep.subr.bf16.mxu0 %v1668_v25  ;;  %1750 = vmatpush3.bf16.msra.mxu1 %v1664_v22  ;;  %v878_v22 = vld [vmem:[%s2181_s5 + $0x20] sm:$0xff] }
  0x23   : > { %1743 = vmatprep.subr.bf16.mxu1 %v1668_v25  ;;  %v1712_v24 = vpack.c.bf16 %v879_v23, %v878_v22 }
  0x25   : > { %1671 = vmatpush3.bf16.msra.mxu0 %v1668_v25 }
  0x26   : > { %1751 = vmatpush3.bf16.msra.mxu1 %v1668_v25  ;;  %1705 = vmatprep.subr.bf16.mxu0 %v1704_v19  ;;  %v880_v25 = vld [vmem:[%s2181_s5 + $0x30] sm:$0xff] }
  0x27   : > { %1673 = vmatprep.subr.bf16.mxu1 %v1672_v28  ;;  %v1716_v27 = vpack.c.bf16 %v881_v26, %v880_v25 }
  0x28   : > { %1433 = vmatmul.mubr.f32.vlgmr.msra.gmra.mrb[0].mxu0 %v283_v31  ;;  %v884_v31 = vld [vmem:[%s2181_s5 + $0x50] sm:$0xff] }
  0x29   : > { %1435 = vmatprep.mubr.f32.mxu0 %v284_v32  ;;  %1457 = vmatmul.mubr.f32.vlgmr.msra.gmra.mrb[0].mxu1 %v299_v33  ;;  %v885_v32 = vld [vmem:[%s2181_s5 + $0x58] sm:$0xff] }
  0x2a   : > { %1459 = vmatprep.mubr.f32.mxu1 %v300_v34  ;;  %1675 = vmatpush3.bf16.msra.mxu1 %v1672_v28  ;;  %v882_v28 = vld [vmem:[%s2181_s5 + $0x40] sm:$0xff]  ;;  %v1724_v33 = vpack.c.bf16 %v885_v32, %v884_v31 }
  0x2b   : > { %1677 = vmatprep.subr.bf16.mxu1 %v1676_v35  ;;  %1707 = vmatpush3.bf16.msra.mxu0 %v1704_v19  ;;  %v1720_v30 = vpack.c.bf16 %v883_v29, %v882_v28  ;;  %v886_v34 = vld [vmem:[%s2181_s5 + $0x60] sm:$0xff] }
  0x2c   : > { %1436 = vmatmul.mubr.f32.gmra.mrb[2].mxu0 %v285_v38  ;;  %1709 = vmatprep.subr.bf16.mxu0 %v1708_v21 }
  0x2d   : > { %1438 = vmatprep.mubr.f32.mxu0 %v286_v39  ;;  %1460 = vmatmul.mubr.f32.gmra.mrb[2].mxu1 %v301_v40 }
  0x2e   : > { %1462 = vmatprep.mubr.f32.mxu1 %v302_v41  ;;  %1679 = vmatpush3.bf16.msra.mxu1 %v1676_v35  ;;  %v887_v35 = vld [vmem:[%s2181_s5 + $0x68] sm:$0xff] }
  0x2f   : > { %1681 = vmatprep.subr.bf16.mxu1 %v1680_v42  ;;  %1711 = vmatpush3.bf16.msra.mxu0 %v1708_v21  ;;  %v1728_v36 = vpack.c.bf16 %v887_v35, %v886_v34 }
  0x30   : > { %1439 = vmatmul.mubr.f32.gmra.mrb[4].mxu0 %v287_v45  ;;  %1713 = vmatprep.subr.bf16.mxu0 %v1712_v24 }
  0x31   : > { %1441 = vmatprep.mubr.f32.mxu0 %v288_v46  ;;  %1463 = vmatmul.mubr.f32.gmra.mrb[4].mxu1 %v303_v47 }
  0x32   : > { %1465 = vmatprep.mubr.f32.mxu1 %v304_v48  ;;  %1683 = vmatpush3.bf16.msra.mxu1 %v1680_v42 }
  0x33   : > { %1685 = vmatprep.subr.bf16.mxu1 %v1684_v49  ;;  %1715 = vmatpush3.bf16.msra.mxu0 %v1712_v24 }
  0x34   : > { %1442 = vmatmul.mubr.f32.gmra.mrb[6].mxu0 %v289_v52  ;;  %1717 = vmatprep.subr.bf16.mxu0 %v1716_v27 }
  0x35   : > { %1444 = vmatprep.mubr.f32.mxu0 %v290_v53  ;;  %1466 = vmatmul.mubr.f32.gmra.mrb[6].mxu1 %v305_v54 }
  0x36   : > { %1468 = vmatprep.mubr.f32.mxu1 %v306_v55  ;;  %1687 = vmatpush3.bf16.msra.mxu1 %v1684_v49 }
  0x37   : > { %1689 = vmatprep.subr.bf16.mxu1 %v1688_v56  ;;  %1719 = vmatpush3.bf16.msra.mxu0 %v1716_v27 }
  0x38   : > { %1445 = vmatmul.mubr.f32.gmra.mrb[8].mxu0 %v291_v59  ;;  %1721 = vmatprep.subr.bf16.mxu0 %v1720_v30 }
  0x39   : > { %1447 = vmatprep.mubr.f32.mxu0 %v292_v60  ;;  %1469 = vmatmul.mubr.f32.gmra.mrb[8].mxu1 %v307_v61 }
  0x3a   : > { %1471 = vmatprep.mubr.f32.mxu1 %v308_v62  ;;  %1691 = vmatpush3.bf16.msra.mxu1 %v1688_v56 }
  0x3b   : > { %1693 = vmatprep.subr.bf16.mxu1 %v1692_v63  ;;  %1723 = vmatpush3.bf16.msra.mxu0 %v1720_v30 }
  0x3c   : > { %1448 = vmatmul.mubr.f32.gmra.mrb[10].mxu0 %v293_v2  ;;  %1725 = vmatprep.subr.bf16.mxu0 %v1724_v33 }
  0x3d   : > { %1450 = vmatprep.mubr.f32.mxu0 %v294_v3  ;;  %1472 = vmatmul.mubr.f32.gmra.mrb[10].mxu1 %v309_v4 }
  0x3e   : > { %1474 = vmatprep.mubr.f32.mxu1 %v310_v5  ;;  %1695 = vmatpush3.bf16.msra.mxu1 %v1692_v63 }
  0x3f   : > { %1697 = vmatprep.subr.bf16.mxu1 %v1696_v6  ;;  %1727 = vmatpush3.bf16.msra.mxu0 %v1724_v33 }
  0x40   : > { %1451 = vmatmul.mubr.f32.gmra.mrb[12].mxu0 %v295_v7  ;;  %1729 = vmatprep.subr.bf16.mxu0 %v1728_v36 }
  0x41   : > { %1453 = vmatprep.mubr.f32.mxu0 %v296_v8  ;;  %1475 = vmatmul.mubr.f32.gmra.mrb[12].mxu1 %v311_v9 }
  0x42   : > { %1477 = vmatprep.mubr.f32.mxu1 %v312_v10  ;;  %1699 = vmatpush3.bf16.msra.mxu1 %v1696_v6 }
  0x43   : > { %1701 = vmatprep.subr.bf16.mxu1 %v1700_v15  ;;  %1731 = vmatpush3.bf16.msra.mxu0 %v1728_v36 }
  0x44   : > { %1454 = vmatmul.mubr.f32.gmra.mrb[14].mxu0 %v297_v11 }
  0x45   : > { %1478 = vmatmul.mubr.f32.gmra.mrb[14].mxu1 %v313_v12 }
  0x46   : > { %1703 = vmatpush3.bf16.msra.mxu1 %v1700_v15 }
  0xfb   : > { %v1434_v38 = vpop.f32.mrb[0].mxu0 }
  0xfc   : > { %v409_v39 = vadd.f32 %v1434_v38, %v1999_v37  ;;  %v403_v40 = vpop.f32.mrb[1].mxu0  ;;  %v2002_v41 = vpop.f32.mrb[0].mxu1 }
  0xfd   : > { %v404_v42 = vadd.f32 %v1999_v37, %v403_v40  ;;  %v2005_v43 = vpop.f32.mrb[1].mxu1 }
  0xfe   : > { %v563_v46 = vmax.f32 %v409_v39, 0.0  ;;  %v484_v30 = vadd.f32 %v1999_v37, %v2005_v43 }
  0xff   : > { %v562_v44 = vmax.f32 %v404_v42, 0.0  ;;  %v1437_v45 = vpop.f32.mrb[2].mxu0 }
 0x100   : > { %v419_v47 = vadd.f32 %v1437_v45, %v1999_v37  ;;  %v413_v48 = vpop.f32.mrb[3].mxu0  ;;  %v2008_v49 = vpop.f32.mrb[2].mxu1  ;;  %v578_v39 = vmax.f32 %v484_v30, 0.0 }
 0x101   : > { %v414_v50 = vadd.f32 %v1999_v37, %v413_v48  ;;  %1512 = vmatprep.mubr.f32.mxu1 %v562_v44  ;;  %v2011_v51 = vpop.f32.mrb[3].mxu1  ;;  %v489_v44 = vadd.f32 %v2002_v41, %v1999_v37 }
 0x102   : > { %1513 = vmatmul.mubr.f32.vlgmr.msra.gmra.mrb[16].mxu1 %v563_v46  ;;  %v565_v54 = vmax.f32 %v419_v47, 0.0  ;;  %v494_v40 = vadd.f32 %v1999_v37, %v2011_v51  ;;  %v499_v47 = vadd.f32 %v2008_v49, %v1999_v37 }
 0x103   : > { %v564_v52 = vmax.f32 %v414_v50, 0.0  ;;  %v1440_v53 = vpop.f32.mrb[4].mxu0  ;;  %v579_v46 = vmax.f32 %v489_v44, 0.0 }
 0x104   : > { %v429_v55 = vadd.f32 %v1440_v53, %v1999_v37  ;;  %v423_v56 = vpop.f32.mrb[5].mxu0  ;;  %v2014_v57 = vpop.f32.mrb[4].mxu1  ;;  %v580_v43 = vmax.f32 %v494_v40, 0.0  ;;  %v581_v51 = vmax.f32 %v499_v47, 0.0 }
 0x105   : > { %v424_v58 = vadd.f32 %v1999_v37, %v423_v56  ;;  %1515 = vmatprep.mubr.f32.mxu1 %v564_v52  ;;  %v503_v59 = vpop.f32.mrb[5].mxu1  ;;  %v509_v52 = vadd.f32 %v2014_v57, %v1999_v37 }
 0x106   : > { %1516 = vmatmul.mubr.f32.gmra.mrb[18].mxu1 %v565_v54  ;;  %v567_v62 = vmax.f32 %v429_v55, 0.0  ;;  %v504_v45 = vadd.f32 %v1999_v37, %v503_v59 }
 0x107   : > { %v566_v60 = vmax.f32 %v424_v58, 0.0  ;;  %v1443_v61 = vpop.f32.mrb[6].mxu0  ;;  %v583_v54 = vmax.f32 %v509_v52, 0.0 }
 0x108   : > { %v439_v63 = vadd.f32 %v1443_v61, %v1999_v37  ;;  %v433_v0 = vpop.f32.mrb[7].mxu0  ;;  %v2018_v1 = vpop.f32.mrb[6].mxu1  ;;  %v582_v48 = vmax.f32 %v504_v45, 0.0 }
 0x109   : > { %v434_v2 = vadd.f32 %v1999_v37, %v433_v0  ;;  %1518 = vmatprep.mubr.f32.mxu1 %v566_v60  ;;  %v513_v3 = vpop.f32.mrb[7].mxu1  ;;  %v519_v55 = vadd.f32 %v2018_v1, %v1999_v37 }
 0x10a   : > { %1519 = vmatmul.mubr.f32.gmra.mrb[20].mxu1 %v567_v62  ;;  %v569_v6 = vmax.f32 %v439_v63, 0.0  ;;  %v514_v50 = vadd.f32 %v1999_v37, %v513_v3 }
 0x10b   : > { %v568_v4 = vmax.f32 %v434_v2, 0.0  ;;  %v1446_v5 = vpop.f32.mrb[8].mxu0  ;;  %v585_v58 = vmax.f32 %v519_v55, 0.0 }
 0x10c   : > { %v449_v7 = vadd.f32 %v1446_v5, %v1999_v37  ;;  %v443_v8 = vpop.f32.mrb[9].mxu0  ;;  %v2022_v9 = vpop.f32.mrb[8].mxu1  ;;  %v584_v41 = vmax.f32 %v514_v50, 0.0 }
 0x10d   : > { %v444_v10 = vadd.f32 %v1999_v37, %v443_v8  ;;  %1521 = vmatprep.mubr.f32.mxu1 %v568_v4  ;;  %v523_v11 = vpop.f32.mrb[9].mxu1  ;;  %v529_v59 = vadd.f32 %v2022_v9, %v1999_v37  ;;  %v889_v8 = vld [vmem:[%s2181_s5 + $0x78] sm:$0xff] }
 0x10e   : > { %1522 = vmatmul.mubr.f32.gmra.mrb[22].mxu1 %v569_v6  ;;  %v571_v14 = vmax.f32 %v449_v7, 0.0  ;;  %v524_v53 = vadd.f32 %v1999_v37, %v523_v11  ;;  %v888_v7 = vld [vmem:[%s2181_s5 + $0x70] sm:$0xff] }
 0x10f   : > { %v570_v12 = vmax.f32 %v444_v10, 0.0  ;;  %v1449_v13 = vpop.f32.mrb[10].mxu0  ;;  %v587_v61 = vmax.f32 %v529_v59, 0.0  ;;  %v1732_v9 = vpack.c.bf16 %v889_v8, %v888_v7  ;;  %v2063_v10 = vld [vmem:[%s2180_s4] ss:$0 sm:$0xff] }
 0x110   : > { %v459_v15 = vadd.f32 %v1449_v13, %v1999_v37  ;;  %v453_v16 = vpop.f32.mrb[11].mxu0  ;;  %v1473_v17 = vpop.f32.mrb[10].mxu1  ;;  %v586_v49 = vmax.f32 %v524_v53, 0.0 }
 0x111   : > { %v454_v18 = vadd.f32 %v1999_v37, %v453_v16  ;;  %1524 = vmatprep.mubr.f32.mxu1 %v570_v12  ;;  %v533_v19 = vpop.f32.mrb[11].mxu1  ;;  %v539_v62 = vadd.f32 %v1473_v17, %v1999_v37  ;;  %1733 = vmatprep.subr.bf16.mxu0 %v1732_v9 }
 0x112   : > { %1525 = vmatmul.mubr.f32.gmra.mrb[24].mxu1 %v571_v14  ;;  %v573_v22 = vmax.f32 %v459_v15, 0.0  ;;  %v534_v56 = vadd.f32 %v1999_v37, %v533_v19  ;;  %1735 = vmatpush3.bf16.msra.mxu0 %v1732_v9 }
 0x113   : > { %v572_v20 = vmax.f32 %v454_v18, 0.0  ;;  %v1452_v21 = vpop.f32.mrb[12].mxu0  ;;  %v589_v1 = vmax.f32 %v539_v62, 0.0 }
 0x114   : > { %v469_v23 = vadd.f32 %v1452_v21, %v1999_v37  ;;  %v463_v24 = vpop.f32.mrb[13].mxu0  ;;  %v1476_v25 = vpop.f32.mrb[12].mxu1  ;;  %v588_v57 = vmax.f32 %v534_v56, 0.0 }
 0x115   : > { %v464_v26 = vadd.f32 %v1999_v37, %v463_v24  ;;  %1527 = vmatprep.mubr.f32.mxu1 %v572_v20  ;;  %v543_v27 = vpop.f32.mrb[13].mxu1  ;;  %v549_v2 = vadd.f32 %v1476_v25, %v1999_v37 }
 0x116   : > { %1528 = vmatmul.mubr.f32.gmra.mrb[26].mxu1 %v573_v22  ;;  %v575_v31 = vmax.f32 %v469_v23, 0.0  ;;  %v544_v60 = vadd.f32 %v1999_v37, %v543_v27 }
 0x117   : > { %v574_v28 = vmax.f32 %v464_v26, 0.0  ;;  %v1455_v29 = vpop.f32.mrb[14].mxu0  ;;  %v591_v4 = vmax.f32 %v549_v2, 0.0 }
 0x118   : > { %v479_v32 = vadd.f32 %v1455_v29, %v1999_v37  ;;  %v473_v33 = vpop.f32.mrb[15].mxu0  ;;  %v1479_v34 = vpop.f32.mrb[14].mxu1  ;;  %v590_v63 = vmax.f32 %v544_v60, 0.0 }
 0x119   : > { %v474_v35 = vadd.f32 %v1999_v37, %v473_v33  ;;  %1530 = vmatprep.mubr.f32.mxu1 %v574_v28  ;;  %v553_v36 = vpop.f32.mrb[15].mxu1  ;;  %v559_v5 = vadd.f32 %v1479_v34, %v1999_v37 }
 0x11a   : > { %1531 = vmatmul.mubr.f32.gmra.mrb[28].mxu1 %v575_v31  ;;  %v577_v42 = vmax.f32 %v479_v32, 0.0  ;;  %v554_v0 = vadd.f32 %v1999_v37, %v553_v36 }
 0x11b   : > { %v576_v38 = vmax.f32 %v474_v35, 0.0  ;;  %v593_v6 = vmax.f32 %v559_v5, 0.0 }
 0x11c   : > { %v592_v3 = vmax.f32 %v554_v0, 0.0 }
 0x11d   : > { %1533 = vmatprep.mubr.f32.mxu1 %v576_v38 }
 0x11e   : > { %1534 = vmatmul.mubr.f32.gmra.mrb[30].mxu1 %v577_v42 }
 0x11f   : > { %1536 = vmatprep.mubr.f32.mxu1 %v578_v39 }
 0x122   : > { %1537 = vmatmul.mubr.f32.gmra.mrb[32].mxu1 %v579_v46 }
 0x123   : > { %1539 = vmatprep.mubr.f32.mxu1 %v580_v43 }
 0x126   : > { %1540 = vmatmul.mubr.f32.gmra.mrb[34].mxu1 %v581_v51 }
 0x127   : > { %1542 = vmatprep.mubr.f32.mxu1 %v582_v48 }
 0x12a   : > { %1543 = vmatmul.mubr.f32.gmra.mrb[36].mxu1 %v583_v54 }
 0x12b   : > { %1545 = vmatprep.mubr.f32.mxu1 %v584_v41 }
 0x12e   : > { %1546 = vmatmul.mubr.f32.gmra.mrb[38].mxu1 %v585_v58 }
 0x12f   : > { %1548 = vmatprep.mubr.f32.mxu1 %v586_v49 }
 0x132   : > { %1549 = vmatmul.mubr.f32.gmra.mrb[40].mxu1 %v587_v61 }
 0x133   : > { %1551 = vmatprep.mubr.f32.mxu1 %v588_v57 }
 0x136   : > { %1552 = vmatmul.mubr.f32.gmra.mrb[42].mxu1 %v589_v1 }
 0x137   : > { %1554 = vmatprep.mubr.f32.mxu1 %v590_v63 }
 0x13a   : > { %1555 = vmatmul.mubr.f32.gmra.mrb[44].mxu1 %v591_v4 }
 0x13b   : > { %1557 = vmatprep.mubr.f32.mxu1 %v592_v3 }
 0x13e   : > { %1558 = vmatmul.mubr.f32.gmra.mrb[46].mxu1 %v593_v6 }
 0x1d5   : > { %v1514_v37 = vpop.f32.mrb[16].mxu1 }
 0x1d6   : > { %v689_v11 = vadd.f32 %v1514_v37, %v2063_v10  ;;  %v683_v12 = vpop.f32.mrb[17].mxu1 }
 0x1d7   : > { %v684_v13 = vadd.f32 %v2063_v10, %v683_v12 }
 0x1d8   : > { %v843_v16 = vmax.f32 %v689_v11, 0.0 }
 0x1d9   : > { %v842_v14 = vmax.f32 %v684_v13, 0.0  ;;  %v1517_v15 = vpop.f32.mrb[18].mxu1 }
 0x1da   : > { %v699_v17 = vadd.f32 %v1517_v15, %v2063_v10  ;;  %v693_v18 = vpop.f32.mrb[19].mxu1 }
 0x1db   : > { %v694_v19 = vadd.f32 %v2063_v10, %v693_v18  ;;  %1592 = vmatprep.mubr.f32.mxu0 %v842_v14 }
 0x1dc   : > { %1593 = vmatmul.mubr.f32.vlgmr.msra.gmra.mrb[16].mxu0 %v843_v16  ;;  %v845_v22 = vmax.f32 %v699_v17, 0.0 }
 0x1dd   : > { %v844_v20 = vmax.f32 %v694_v19, 0.0  ;;  %v1520_v21 = vpop.f32.mrb[20].mxu1 }
 0x1de   : > { %v709_v23 = vadd.f32 %v1520_v21, %v2063_v10  ;;  %v703_v24 = vpop.f32.mrb[21].mxu1 }
 0x1df   : > { %v704_v25 = vadd.f32 %v2063_v10, %v703_v24  ;;  %1595 = vmatprep.mubr.f32.mxu0 %v844_v20 }
 0x1e0   : > { %1596 = vmatmul.mubr.f32.gmra.mrb[18].mxu0 %v845_v22  ;;  %v847_v28 = vmax.f32 %v709_v23, 0.0 }
 0x1e1   : > { %v846_v26 = vmax.f32 %v704_v25, 0.0  ;;  %v1523_v27 = vpop.f32.mrb[22].mxu1 }
 0x1e2   : > { %v719_v29 = vadd.f32 %v1523_v27, %v2063_v10  ;;  %v713_v30 = vpop.f32.mrb[23].mxu1 }
 0x1e3   : > { %v714_v31 = vadd.f32 %v2063_v10, %v713_v30  ;;  %1598 = vmatprep.mubr.f32.mxu0 %v846_v26 }
 0x1e4   : > { %1599 = vmatmul.mubr.f32.gmra.mrb[20].mxu0 %v847_v28  ;;  %v849_v34 = vmax.f32 %v719_v29, 0.0 }
 0x1e5   : > { %v848_v32 = vmax.f32 %v714_v31, 0.0  ;;  %v1526_v33 = vpop.f32.mrb[24].mxu1 }
 0x1e6   : > { %v729_v35 = vadd.f32 %v1526_v33, %v2063_v10  ;;  %v723_v36 = vpop.f32.mrb[25].mxu1 }
 0x1e7   : > { %v724_v38 = vadd.f32 %v2063_v10, %v723_v36  ;;  %1601 = vmatprep.mubr.f32.mxu0 %v848_v32 }
 0x1e8   : > { %1602 = vmatmul.mubr.f32.gmra.mrb[22].mxu0 %v849_v34  ;;  %v851_v42 = vmax.f32 %v729_v35, 0.0 }
 0x1e9   : > { %v850_v39 = vmax.f32 %v724_v38, 0.0  ;;  %v1529_v40 = vpop.f32.mrb[26].mxu1 }
 0x1ea   : > { %v739_v44 = vadd.f32 %v1529_v40, %v2063_v10  ;;  %v733_v43 = vpop.f32.mrb[27].mxu1 }
 0x1eb   : > { %v734_v45 = vadd.f32 %v2063_v10, %v733_v43  ;;  %1604 = vmatprep.mubr.f32.mxu0 %v850_v39 }
 0x1ec   : > { %1605 = vmatmul.mubr.f32.gmra.mrb[24].mxu0 %v851_v42  ;;  %v853_v48 = vmax.f32 %v739_v44, 0.0 }
 0x1ed   : > { %v852_v46 = vmax.f32 %v734_v45, 0.0  ;;  %v1532_v47 = vpop.f32.mrb[28].mxu1  ;;  %v2100_v45 = vld [vmem:[%s2182_s6] ss:$0 sm:$0xff] }
 0x1ee   : > { %v749_v50 = vadd.f32 %v1532_v47, %v2063_v10  ;;  %v743_v51 = vpop.f32.mrb[29].mxu1 }
 0x1ef   : > { %v744_v52 = vadd.f32 %v2063_v10, %v743_v51  ;;  %1607 = vmatprep.mubr.f32.mxu0 %v852_v46 }
 0x1f0   : > { %1608 = vmatmul.mubr.f32.gmra.mrb[26].mxu0 %v853_v48  ;;  %v855_v54 = vmax.f32 %v749_v50, 0.0 }
 0x1f1   : > { %v854_v41 = vmax.f32 %v744_v52, 0.0  ;;  %v1535_v53 = vpop.f32.mrb[30].mxu1 }
 0x1f2   : > { %v759_v55 = vadd.f32 %v1535_v53, %v2063_v10  ;;  %v753_v49 = vpop.f32.mrb[31].mxu1 }
 0x1f3   : > { %v754_v56 = vadd.f32 %v2063_v10, %v753_v49  ;;  %1610 = vmatprep.mubr.f32.mxu0 %v854_v41 }
 0x1f4   : > { %1611 = vmatmul.mubr.f32.gmra.mrb[28].mxu0 %v855_v54  ;;  %v857_v57 = vmax.f32 %v759_v55, 0.0 }
 0x1f5   : > { %v856_v58 = vmax.f32 %v754_v56, 0.0  ;;  %v1538_v59 = vpop.f32.mrb[32].mxu1 }
 0x1f6   : > { %v769_v60 = vadd.f32 %v1538_v59, %v2063_v10  ;;  %v763_v61 = vpop.f32.mrb[33].mxu1 }
 0x1f7   : > { %v764_v62 = vadd.f32 %v2063_v10, %v763_v61  ;;  %1613 = vmatprep.mubr.f32.mxu0 %v856_v58 }
 0x1f8   : > { %1614 = vmatmul.mubr.f32.gmra.mrb[30].mxu0 %v857_v57  ;;  %v859_v1 = vmax.f32 %v769_v60, 0.0 }
 0x1f9   : > { %v858_v63 = vmax.f32 %v764_v62, 0.0  ;;  %v1541_v0 = vpop.f32.mrb[34].mxu1 }
 0x1fa   : > { %v779_v2 = vadd.f32 %v1541_v0, %v2063_v10  ;;  %v773_v3 = vpop.f32.mrb[35].mxu1 }
 0x1fb   : > { %v774_v4 = vadd.f32 %v2063_v10, %v773_v3  ;;  %1616 = vmatprep.mubr.f32.mxu0 %v858_v63 }
 0x1fc   : > { %1617 = vmatmul.mubr.f32.gmra.mrb[32].mxu0 %v859_v1  ;;  %v861_v7 = vmax.f32 %v779_v2, 0.0 }
 0x1fd   : > { %v860_v5 = vmax.f32 %v774_v4, 0.0  ;;  %v1544_v6 = vpop.f32.mrb[36].mxu1 }
 0x1fe   : > { %v789_v8 = vadd.f32 %v1544_v6, %v2063_v10  ;;  %v783_v9 = vpop.f32.mrb[37].mxu1 }
 0x1ff   : > { %v784_v37 = vadd.f32 %v2063_v10, %v783_v9  ;;  %1619 = vmatprep.mubr.f32.mxu0 %v860_v5 }
 0x200   : > { %1620 = vmatmul.mubr.f32.gmra.mrb[34].mxu0 %v861_v7  ;;  %v863_v13 = vmax.f32 %v789_v8, 0.0 }
 0x201   : > { %v862_v11 = vmax.f32 %v784_v37, 0.0  ;;  %v1547_v12 = vpop.f32.mrb[38].mxu1 }
 0x202   : > { %v799_v14 = vadd.f32 %v1547_v12, %v2063_v10  ;;  %v793_v15 = vpop.f32.mrb[39].mxu1 }
 0x203   : > { %v794_v16 = vadd.f32 %v2063_v10, %v793_v15  ;;  %1622 = vmatprep.mubr.f32.mxu0 %v862_v11 }
 0x204   : > { %1623 = vmatmul.mubr.f32.gmra.mrb[36].mxu0 %v863_v13  ;;  %v865_v19 = vmax.f32 %v799_v14, 0.0 }
 0x205   : > { %v864_v17 = vmax.f32 %v794_v16, 0.0  ;;  %v1550_v18 = vpop.f32.mrb[40].mxu1 }
 0x206   : > { %v809_v20 = vadd.f32 %v1550_v18, %v2063_v10  ;;  %v803_v21 = vpop.f32.mrb[41].mxu1 }
 0x207   : > { %v804_v22 = vadd.f32 %v2063_v10, %v803_v21  ;;  %1625 = vmatprep.mubr.f32.mxu0 %v864_v17 }
 0x208   : > { %1626 = vmatmul.mubr.f32.gmra.mrb[38].mxu0 %v865_v19  ;;  %v867_v25 = vmax.f32 %v809_v20, 0.0 }
 0x209   : > { %v866_v23 = vmax.f32 %v804_v22, 0.0  ;;  %v1553_v24 = vpop.f32.mrb[42].mxu1 }
 0x20a   : > { %v819_v26 = vadd.f32 %v1553_v24, %v2063_v10  ;;  %v813_v27 = vpop.f32.mrb[43].mxu1 }
 0x20b   : > { %v814_v28 = vadd.f32 %v2063_v10, %v813_v27  ;;  %1628 = vmatprep.mubr.f32.mxu0 %v866_v23 }
 0x20c   : > { %1629 = vmatmul.mubr.f32.gmra.mrb[40].mxu0 %v867_v25  ;;  %v869_v31 = vmax.f32 %v819_v26, 0.0 }
 0x20d   : > { %v868_v29 = vmax.f32 %v814_v28, 0.0  ;;  %v1556_v30 = vpop.f32.mrb[44].mxu1 }
 0x20e   : > { %v829_v32 = vadd.f32 %v1556_v30, %v2063_v10  ;;  %v823_v33 = vpop.f32.mrb[45].mxu1 }
 0x20f   : > { %v824_v34 = vadd.f32 %v2063_v10, %v823_v33  ;;  %1631 = vmatprep.mubr.f32.mxu0 %v868_v29 }
 0x210   : > { %1632 = vmatmul.mubr.f32.gmra.mrb[42].mxu0 %v869_v31  ;;  %v871_v38 = vmax.f32 %v829_v32, 0.0 }
 0x211   : > { %v870_v35 = vmax.f32 %v824_v34, 0.0  ;;  %v1559_v36 = vpop.f32.mrb[46].mxu1 }
 0x212   : > { %v839_v39 = vadd.f32 %v1559_v36, %v2063_v10  ;;  %v833_v40 = vpop.f32.mrb[47].mxu1 }
 0x213   : > { %v834_v42 = vadd.f32 %v2063_v10, %v833_v40  ;;  %1634 = vmatprep.mubr.f32.mxu0 %v870_v35 }
 0x214   : > { %1635 = vmatmul.mubr.f32.gmra.mrb[44].mxu0 %v871_v38  ;;  %v873_v43 = vmax.f32 %v839_v39, 0.0 }
 0x215   : > { %v872_v44 = vmax.f32 %v834_v42, 0.0 }
 0x217   : > { %1637 = vmatprep.mubr.f32.mxu0 %v872_v44 }
 0x218   : > { %1638 = vmatmul.mubr.f32.gmra.mrb[46].mxu0 %v873_v43 }
 0x2af   : > { %v1594_v46 = vpop.f32.mrb[16].mxu0 }
 0x2b0   : > { %v969_v47 = vadd.f32 %v1594_v46, %v2100_v45  ;;  %v963_v48 = vpop.f32.mrb[17].mxu0 }
 0x2b1   : > { %v964_v10 = vadd.f32 %v2100_v45, %v963_v48 }
 0x2b2   : > { %v1123_v50 = vmax.f32 %v969_v47, 0.0 }
 0x2b3   : > { %v1122_v51 = vmax.f32 %v964_v10, 0.0  ;;  %v1597_v52 = vpop.f32.mrb[18].mxu0 }
 0x2b4   : > { %1155 = vst [vmem:[%s2108_s13 + $0x8] sm:$0xff] %v1123_v50  ;;  %v979_v41 = vadd.f32 %v1597_v52, %v2100_v45  ;;  %v973_v53 = vpop.f32.mrb[19].mxu0 }
 0x2b5   : > { %1154 = vst [vmem:[%s2108_s13] sm:$0xff] %v1122_v51  ;;  %v974_v54 = vadd.f32 %v2100_v45, %v973_v53 }
 0x2b6   : > { %v1125_v55 = vmax.f32 %v979_v41, 0.0 }
 0x2b7   : > { %v1124_v49 = vmax.f32 %v974_v54, 0.0  ;;  %v1600_v56 = vpop.f32.mrb[20].mxu0 }
 0x2b8   : > { %1157 = vst [vmem:[%s2108_s13 + $0x18] sm:$0xff] %v1125_v55  ;;  %v989_v58 = vadd.f32 %v1600_v56, %v2100_v45  ;;  %v983_v59 = vpop.f32.mrb[21].mxu0 }
 0x2b9   : > { %1156 = vst [vmem:[%s2108_s13 + $0x10] sm:$0xff] %v1124_v49  ;;  %v984_v57 = vadd.f32 %v2100_v45, %v983_v59 }
 0x2ba   : > { %v1127_v60 = vmax.f32 %v989_v58, 0.0 }
 0x2bb   : > { %v1126_v61 = vmax.f32 %v984_v57, 0.0  ;;  %v1603_v62 = vpop.f32.mrb[22].mxu0 }
 0x2bc   : > { %1159 = vst [vmem:[%s2108_s13 + $0x28] sm:$0xff] %v1127_v60  ;;  %v999_v63 = vadd.f32 %v1603_v62, %v2100_v45  ;;  %v993_v0 = vpop.f32.mrb[23].mxu0 }
 0x2bd   : > { %1158 = vst [vmem:[%s2108_s13 + $0x20] sm:$0xff] %v1126_v61  ;;  %v994_v1 = vadd.f32 %v2100_v45, %v993_v0 }
 0x2be   : > { %v1129_v2 = vmax.f32 %v999_v63, 0.0 }
 0x2bf   : > { %v1128_v3 = vmax.f32 %v994_v1, 0.0  ;;  %v1606_v4 = vpop.f32.mrb[24].mxu0 }
 0x2c0   : > { %1161 = vst [vmem:[%s2108_s13 + $0x38] sm:$0xff] %v1129_v2  ;;  %v1009_v5 = vadd.f32 %v1606_v4, %v2100_v45  ;;  %v1003_v6 = vpop.f32.mrb[25].mxu0 }
 0x2c1   : > { %1160 = vst [vmem:[%s2108_s13 + $0x30] sm:$0xff] %v1128_v3  ;;  %v1004_v7 = vadd.f32 %v2100_v45, %v1003_v6 }
 0x2c2   : > { %v1131_v8 = vmax.f32 %v1009_v5, 0.0 }
 0x2c3   : > { %v1130_v9 = vmax.f32 %v1004_v7, 0.0  ;;  %v1609_v37 = vpop.f32.mrb[26].mxu0 }
 0x2c4   : > { %1163 = vst [vmem:[%s2108_s13 + $0x48] sm:$0xff] %v1131_v8  ;;  %v1019_v11 = vadd.f32 %v1609_v37, %v2100_v45  ;;  %v1013_v12 = vpop.f32.mrb[27].mxu0 }
 0x2c5   : > { %1162 = vst [vmem:[%s2108_s13 + $0x40] sm:$0xff] %v1130_v9  ;;  %v1014_v13 = vadd.f32 %v2100_v45, %v1013_v12 }
 0x2c6   : > { %v1133_v14 = vmax.f32 %v1019_v11, 0.0 }
 0x2c7   : > { %v1132_v15 = vmax.f32 %v1014_v13, 0.0  ;;  %v1612_v16 = vpop.f32.mrb[28].mxu0 }
 0x2c8   : > { %1165 = vst [vmem:[%s2108_s13 + $0x58] sm:$0xff] %v1133_v14  ;;  %v1029_v17 = vadd.f32 %v1612_v16, %v2100_v45  ;;  %v1023_v18 = vpop.f32.mrb[29].mxu0 }
 0x2c9   : > { %1164 = vst [vmem:[%s2108_s13 + $0x50] sm:$0xff] %v1132_v15  ;;  %v1024_v19 = vadd.f32 %v2100_v45, %v1023_v18 }
 0x2ca   : > { %v1135_v20 = vmax.f32 %v1029_v17, 0.0 }
 0x2cb   : > { %v1134_v21 = vmax.f32 %v1024_v19, 0.0  ;;  %v1615_v22 = vpop.f32.mrb[30].mxu0 }
 0x2cc   : > { %1167 = vst [vmem:[%s2108_s13 + $0x68] sm:$0xff] %v1135_v20  ;;  %v1039_v23 = vadd.f32 %v1615_v22, %v2100_v45  ;;  %v1033_v24 = vpop.f32.mrb[31].mxu0 }
 0x2cd   : > { %1166 = vst [vmem:[%s2108_s13 + $0x60] sm:$0xff] %v1134_v21  ;;  %v1034_v25 = vadd.f32 %v2100_v45, %v1033_v24 }
 0x2ce   : > { %v1137_v26 = vmax.f32 %v1039_v23, 0.0 }
 0x2cf   : > { %v1136_v27 = vmax.f32 %v1034_v25, 0.0  ;;  %v1618_v28 = vpop.f32.mrb[32].mxu0 }
 0x2d0   : > { %1169 = vst [vmem:[%s2108_s13 + $0x78] sm:$0xff] %v1137_v26  ;;  %v1049_v29 = vadd.f32 %v1618_v28, %v2100_v45  ;;  %v1043_v30 = vpop.f32.mrb[33].mxu0 }
 0x2d1   : > { %1168 = vst [vmem:[%s2108_s13 + $0x70] sm:$0xff] %v1136_v27  ;;  %v1044_v31 = vadd.f32 %v2100_v45, %v1043_v30 }
 0x2d2   : > { %v1139_v32 = vmax.f32 %v1049_v29, 0.0 }
 0x2d3   : > { %v1138_v33 = vmax.f32 %v1044_v31, 0.0  ;;  %v1621_v34 = vpop.f32.mrb[34].mxu0 }
 0x2d4   : > { %1171 = vst [vmem:[%s2108_s13 + $0x88] sm:$0xff] %v1139_v32  ;;  %v1059_v35 = vadd.f32 %v1621_v34, %v2100_v45  ;;  %v1053_v36 = vpop.f32.mrb[35].mxu0 }
 0x2d5   : > { %1170 = vst [vmem:[%s2108_s13 + $0x80] sm:$0xff] %v1138_v33  ;;  %v1054_v38 = vadd.f32 %v2100_v45, %v1053_v36 }
 0x2d6   : > { %v1141_v39 = vmax.f32 %v1059_v35, 0.0 }
 0x2d7   : > { %v1140_v40 = vmax.f32 %v1054_v38, 0.0  ;;  %v1624_v42 = vpop.f32.mrb[36].mxu0 }
 0x2d8   : > { %1173 = vst [vmem:[%s2108_s13 + $0x98] sm:$0xff] %v1141_v39  ;;  %v1069_v44 = vadd.f32 %v1624_v42, %v2100_v45  ;;  %v1063_v43 = vpop.f32.mrb[37].mxu0 }
 0x2d9   : > { %1172 = vst [vmem:[%s2108_s13 + $0x90] sm:$0xff] %v1140_v40  ;;  %v1064_v46 = vadd.f32 %v2100_v45, %v1063_v43 }
 0x2da   : > { %v1143_v47 = vmax.f32 %v1069_v44, 0.0 }
 0x2db   : > { %v1142_v48 = vmax.f32 %v1064_v46, 0.0  ;;  %v1627_v10 = vpop.f32.mrb[38].mxu0 }
 0x2dc   : > { %1175 = vst [vmem:[%s2108_s13 + $0xa8] sm:$0xff] %v1143_v47  ;;  %v1079_v50 = vadd.f32 %v1627_v10, %v2100_v45  ;;  %v1073_v51 = vpop.f32.mrb[39].mxu0 }
 0x2dd   : > { %1174 = vst [vmem:[%s2108_s13 + $0xa0] sm:$0xff] %v1142_v48  ;;  %v1074_v52 = vadd.f32 %v2100_v45, %v1073_v51 }
 0x2de   : > { %v1145_v41 = vmax.f32 %v1079_v50, 0.0 }
 0x2df   : > { %v1144_v53 = vmax.f32 %v1074_v52, 0.0  ;;  %v1630_v54 = vpop.f32.mrb[40].mxu0 }
 0x2e0   : > { %1177 = vst [vmem:[%s2108_s13 + $0xb8] sm:$0xff] %v1145_v41  ;;  %v1089_v55 = vadd.f32 %v1630_v54, %v2100_v45  ;;  %v1083_v49 = vpop.f32.mrb[41].mxu0 }
 0x2e1   : > { %1176 = vst [vmem:[%s2108_s13 + $0xb0] sm:$0xff] %v1144_v53  ;;  %v1084_v56 = vadd.f32 %v2100_v45, %v1083_v49 }
 0x2e2   : > { %v1147_v58 = vmax.f32 %v1089_v55, 0.0 }
 0x2e3   : > { %v1146_v59 = vmax.f32 %v1084_v56, 0.0  ;;  %v1633_v57 = vpop.f32.mrb[42].mxu0 }
 0x2e4   : > { %1179 = vst [vmem:[%s2108_s13 + $0xc8] sm:$0xff] %v1147_v58  ;;  %v1099_v60 = vadd.f32 %v1633_v57, %v2100_v45  ;;  %v1093_v61 = vpop.f32.mrb[43].mxu0 }
 0x2e5   : > { %1178 = vst [vmem:[%s2108_s13 + $0xc0] sm:$0xff] %v1146_v59  ;;  %v1094_v62 = vadd.f32 %v2100_v45, %v1093_v61 }
 0x2e6   : > { %v1149_v63 = vmax.f32 %v1099_v60, 0.0 }
 0x2e7   : > { %v1148_v0 = vmax.f32 %v1094_v62, 0.0  ;;  %v1636_v1 = vpop.f32.mrb[44].mxu0 }
 0x2e8   : > { %1181 = vst [vmem:[%s2108_s13 + $0xd8] sm:$0xff] %v1149_v63  ;;  %v1109_v2 = vadd.f32 %v1636_v1, %v2100_v45  ;;  %v1103_v3 = vpop.f32.mrb[45].mxu0 }
 0x2e9   : > { %1180 = vst [vmem:[%s2108_s13 + $0xd0] sm:$0xff] %v1148_v0  ;;  %v1104_v4 = vadd.f32 %v2100_v45, %v1103_v3 }
 0x2ea   : > { %v1151_v5 = vmax.f32 %v1109_v2, 0.0 }
 0x2eb   : > { %v1150_v6 = vmax.f32 %v1104_v4, 0.0  ;;  %v1639_v7 = vpop.f32.mrb[46].mxu0 }
 0x2ec   : > { %1183 = vst [vmem:[%s2108_s13 + $0xe8] sm:$0xff] %v1151_v5  ;;  %v1119_v8 = vadd.f32 %v1639_v7, %v2100_v45  ;;  %v1113_v9 = vpop.f32.mrb[47].mxu0 }
 0x2ed   : > { %1182 = vst [vmem:[%s2108_s13 + $0xe0] sm:$0xff] %v1150_v6  ;;  %v1114_v37 = vadd.f32 %v2100_v45, %v1113_v9 }
 0x2ee   : > { %v1153_v11 = vmax.f32 %v1119_v8, 0.0 }
 0x2ef   : > { %v1152_v12 = vmax.f32 %v1114_v37, 0.0 }
 0x2f0   : > { %1185 = vst [vmem:[%s2108_s13 + $0xf8] sm:$0xff] %v1153_v11 }
 0x2f1   : > { %1184 = vst [vmem:[%s2108_s13 + $0xf0] sm:$0xff] %v1152_v12 }
 0x2f2 PF: > { %s17_s24 = sadd.s32 1, %s1766_s24  }
 0x2f3   : > { %p14_p4 = scmp.ge.s32.totalorder %s17_s24, 4  }
 0x2f5   :  { %16 = sbr.rel (!%p14_p4) target bundleno = 1 (0x1), region = 78 }

</bundles_post_ra>
